<compile_context>
chip_gen: v7x
topology: tpu7x:2x2x1
jax: 0.10.0
libtpu: 0.0.40
codegen_flags: <defaults>
</compile_context>

<pallas_src>
from functools import partial

import jax
import jax.numpy as jnp
from jax.experimental import pallas as pl
from jax.experimental.pallas import tpu as pltpu


_MIN_BLOCK_BYTES = 2 * 1024 * 1024          # ~HBM roofline knee per block
_TARGET_GRID_STEPS = 8                      # keep pipeline / 2nd TC (v7x) fed
_DEFAULT_VMEM_CAPACITY = 64 * 1024 * 1024   # conservative fallback (v7x per-TC)


def _cdiv(a, b):
    return -(-a // b)


def _round_up(x, m):
    return ((x + m - 1) // m) * m


def _padded_block_bytes(block_shape, itemsize):
    """VMEM footprint of one block: minor dim pads to 128 lanes, second-minor
    pads to 8*(4/itemsize) sublanes (bf16->16, int8->32), leading dims multiply."""
    if len(block_shape) < 2:
        return _round_up(int(block_shape[0]) * itemsize, 4 * 128)
    sub_mult = 8 * max(1, 4 // itemsize)
    lead = 1
    for d in block_shape[:-2]:
        lead *= int(d)
    return (lead * _round_up(int(block_shape[-2]), sub_mult)
            * _round_up(int(block_shape[-1]), 128) * itemsize)


def _vmem_budget():
    """Generation-aware scoped-VMEM limit and per-step working-set budget."""
    try:
        cap = int(pltpu.get_tpu_info().vmem_capacity_bytes)
    except Exception:
        cap = _DEFAULT_VMEM_CAPACITY
    limit = max(16 * 1024 * 1024, min(48 * 1024 * 1024, cap // 2))
    budget = limit // 2      # in+out blocks, double buffered; rest = headroom
    return budget, limit


def _plan_tiles(n_batch, h_extent, w_extent, block_bytes, budget):
    """Pick (row_tile, col_tile).

    block_bytes(ht, wt) = padded VMEM bytes of one input block + one output
    block. Constraints: col tile is the full extent or a multiple of 8
    (second-minor dim of both blocks); double-buffered working set <= budget;
    grid keeps >= _TARGET_GRID_STEPS steps unless that would push blocks below
    the ~2 MiB HBM-roofline knee.
    """
    def working_set(ht, wt):
        return 2 * block_bytes(ht, wt)      # x2: double buffering

    # Column tiling: only a fallback for rows too wide for the budget.
    wt = w_extent
    while wt > 8 and working_set(1, wt) > budget:
        wt = max(8, (wt // 2) // 8 * 8)

    # Row tile (leading block dim, no alignment constraint): grow to budget.
    ht = 1
    while ht < h_extent and working_set(min(h_extent, ht * 2), wt) <= budget:
        ht = min(h_extent, ht * 2)
    while ht < h_extent and working_set(ht + 1, wt) <= budget:
        ht += 1

    # Keep the pipeline (and v7x's second TensorCore) fed.
    def steps(ht_):
        return n_batch * _cdiv(h_extent, ht_) * _cdiv(w_extent, wt)
    while (ht > 1 and steps(ht) < _TARGET_GRID_STEPS
           and block_bytes(_cdiv(ht, 2), wt) >= _MIN_BLOCK_BYTES):
        ht = _cdiv(ht, 2)
    return ht, wt


def _s2d_fwd_kernel(x_ref, o_ref, *, bs):
    # x_ref: (1, hbt, bs, wbt, bs*C)   o_ref: (1, hbt, wbt, bs*bs*C)
    # Load once, assemble the full output channel row in registers (lane
    # concatenation of the bs row-phase slabs), store once (lane-dense w.r.t.
    # the output tile instead of bs masked partial stores).
    x = x_ref[...]
    o_ref[...] = jnp.concatenate([x[:, :, i] for i in range(bs)], axis=-1)


def _s2d_rev_kernel(x_ref, o_ref, *, bs, bsc):
    # x_ref: (1, ht, wt, bs*bs*C')     o_ref: (1, ht, bs, wt, bs*C')
    # One full-width load; lane-slice per row phase in registers and store the
    # (ht, wt, bs*C') slab (output lane width is bs*C' by construction).
    x = x_ref[...]
    for i in range(bs):                                    # static unroll
        o_ref[0, :, i, :, :] = x[0, :, :, i * bsc:(i + 1) * bsc]


def space_to_depth(x, block_size, rev=False):
    """Exact JAX/Pallas reimplementation of SpaceToDepth.forward (NCHW in/out)."""
    bs = int(block_size)
    N, C, H, W = x.shape
    itemsize = jnp.dtype(x.dtype).itemsize
    budget, vmem_limit = _vmem_budget()

    if not rev:
        assert H % bs == 0 and W % bs == 0
        Hb, Wb = H // bs, W // bs
        bsc = bs * C
        # Glue (XLA): NCHW -> NHWC transpose, then a free row-major reshape.
        x_k = jnp.transpose(x, (0, 2, 3, 1)).reshape(N, Hb, bs, Wb, bsc)

        def block_bytes(ht, wt):
            return (_padded_block_bytes((1, ht, bs, wt, bsc), itemsize)
                    + _padded_block_bytes((1, ht, wt, bs * bsc), itemsize))

        hbt, wbt = _plan_tiles(N, Hb, Wb, block_bytes, budget)
        out = pl.pallas_call(
            partial(_s2d_fwd_kernel, bs=bs),
            out_shape=jax.ShapeDtypeStruct((N, Hb, Wb, bs * bsc), x.dtype),
            grid=(N, _cdiv(Hb, hbt), _cdiv(Wb, wbt)),
            in_specs=[pl.BlockSpec((1, hbt, bs, wbt, bsc),
                                   lambda n, h, w: (n, h, 0, w, 0))],
            out_specs=pl.BlockSpec((1, hbt, wbt, bs * bsc),
                                   lambda n, h, w: (n, h, w, 0)),
            compiler_params=pltpu.CompilerParams(
                dimension_semantics=("parallel", "parallel", "parallel"),
                vmem_limit_bytes=vmem_limit),
        )(x_k)
        # Glue (XLA): NHWC-packed -> NCHW.
        return jnp.transpose(out, (0, 3, 1, 2))
    else:
        assert C % (bs * bs) == 0
        C_out = C // (bs * bs)
        bsc = bs * C_out
        # Glue (XLA): NCHW -> NHWC transpose.
        x_k = jnp.transpose(x, (0, 2, 3, 1))               # (N, H, W, C)

        def block_bytes(ht, wt):
            return (_padded_block_bytes((1, ht, wt, C), itemsize)
                    + _padded_block_bytes((1, ht, bs, wt, bsc), itemsize))

        ht, wt = _plan_tiles(N, H, W, block_bytes, budget)
        out = pl.pallas_call(
            partial(_s2d_rev_kernel, bs=bs, bsc=bsc),
            out_shape=jax.ShapeDtypeStruct((N, H, bs, W, bsc), x.dtype),
            grid=(N, _cdiv(H, ht), _cdiv(W, wt)),
            in_specs=[pl.BlockSpec((1, ht, wt, C),
                                   lambda n, h, w: (n, h, w, 0))],
            out_specs=pl.BlockSpec((1, ht, bs, wt, bsc),
                                   lambda n, h, w: (n, h, 0, w, 0)),
            compiler_params=pltpu.CompilerParams(
                dimension_semantics=("parallel", "parallel", "parallel"),
                vmem_limit_bytes=vmem_limit),
        )(x_k)
        # Free reshape (N,H,bs,W,bs*C') -> (N,H*bs,W*bs,C'), then NHWC -> NCHW.
        out = out.reshape(N, H * bs, W * bs, C_out)
        return jnp.transpose(out, (0, 3, 1, 2))


# ---------------- pure-JAX reference (mirrors the PyTorch code) -------------
def _ref_space_to_depth(x, bs, rev=False):
    N, C, H, W = x.shape
    if not rev:
        x = x.reshape(N, C, H // bs, bs, W // bs, bs)
        x = jnp.transpose(x, (0, 3, 5, 1, 2, 4))
        return x.reshape(N, C * bs * bs, H // bs, W // bs)
    else:
        x = x.reshape(N, bs, bs, C // (bs * bs), H, W)
        x = jnp.transpose(x, (0, 3, 4, 1, 5, 2))
        return x.reshape(N, C // (bs * bs), H * bs, W * bs)


if __name__ == "__main__":
    key = jax.random.PRNGKey(0)
    N, C, H, W = 2, 4, 16, 16
    bs = 2
    x = jax.random.normal(key, (N, C, H, W), dtype=jnp.float32)

    # forward (rev=False)
    y = jax.block_until_ready(space_to_depth(x, bs, rev=False))
    y_ref = _ref_space_to_depth(x, bs, rev=False)
    assert y.shape == (N, C * bs * bs, H // bs, W // bs)
    assert jnp.array_equal(y, y_ref), "forward mismatch vs reference"

    # reverse (rev=True) — must invert the forward pass
    x_back = jax.block_until_ready(space_to_depth(y, bs, rev=True))
    x_back_ref = _ref_space_to_depth(y, bs, rev=True)
    assert x_back.shape == x.shape
    assert jnp.array_equal(x_back, x_back_ref), "reverse mismatch vs reference"
    assert jnp.array_equal(x_back, x), "round-trip mismatch"

    print("KERNEL_OK")
</pallas_src>

<mosaic_0001>
module attributes {stable_mosaic.version = 11 : i64} {
  func.func @_s2d_fwd_kernel(%arg0: i32, %arg1: i32, %arg2: i32, %arg3: memref<1x8x2x8x8xf32, #tpu.memory_space<vmem>>, %arg4: memref<1x8x8x16xf32, #tpu.memory_space<vmem>>) attributes {dimension_semantics = [#tpu.dimension_semantics<parallel>, #tpu.dimension_semantics<parallel>, #tpu.dimension_semantics<parallel>], iteration_bounds = array<i64: 2, 1, 1>, scalar_prefetch = 0 : i64, scratch_operands = 0 : i64, tpu.core_type = #tpu.core_type<tc>, window_params = [{transform_indices = @transform_0, window_bounds = array<i64: 1, 8, 2, 8, 8>}, {transform_indices = @transform_1, window_bounds = array<i64: 1, 8, 8, 16>}]} {
    %c0 = arith.constant 0 : index
    %c0_0 = arith.constant 0 : index
    %c0_1 = arith.constant 0 : index
    %c0_2 = arith.constant 0 : index
    %c0_3 = arith.constant 0 : index
    %0 = vector.load %arg3[%c0, %c0_0, %c0_1, %c0_2, %c0_3] : memref<1x8x2x8x8xf32, #tpu.memory_space<vmem>>, vector<1x8x2x8x8xf32>
    %1 = vector.extract_strided_slice %0 {offsets = [0, 0, 0, 0, 0], sizes = [1, 8, 1, 8, 8], strides = [1, 1, 1, 1, 1]} : vector<1x8x2x8x8xf32> to vector<1x8x1x8x8xf32>
    %2 = vector.shape_cast %1 : vector<1x8x1x8x8xf32> to vector<1x8x8x8xf32>
    %3 = vector.extract_strided_slice %0 {offsets = [0, 0, 1, 0, 0], sizes = [1, 8, 1, 8, 8], strides = [1, 1, 1, 1, 1]} : vector<1x8x2x8x8xf32> to vector<1x8x1x8x8xf32>
    %4 = vector.shape_cast %3 : vector<1x8x1x8x8xf32> to vector<1x8x8x8xf32>
    %5 = tpu.concatenate %2, %4 in 3 : vector<1x8x8x8xf32>, vector<1x8x8x8xf32> -> vector<1x8x8x16xf32>
    %c0_4 = arith.constant 0 : index
    %c0_5 = arith.constant 0 : index
    %c0_6 = arith.constant 0 : index
    %c0_7 = arith.constant 0 : index
    %6 = vector.load %arg4[%c0_4, %c0_5, %c0_6, %c0_7] : memref<1x8x8x16xf32, #tpu.memory_space<vmem>>, vector<1x8x8x16xf32>
    tpu.vector_store %arg4[%c0_4, %c0_5, %c0_6, %c0_7], %5 {strides = array<i32>} : memref<1x8x8x16xf32, #tpu.memory_space<vmem>>, vector<1x8x8x16xf32>,
    return
  }
  func.func @transform_0(%arg0: i32, %arg1: i32, %arg2: i32) -> (i32, i32, i32, i32, i32) {
    %c0_i32 = arith.constant 0 : i32
    %c0_i32_0 = arith.constant 0 : i32
    %c0_i32_1 = arith.constant 0 : i32
    return %arg0, %arg1, %c0_i32, %arg2, %c0_i32_0 : i32, i32, i32, i32, i32
  }
  func.func @transform_1(%arg0: i32, %arg1: i32, %arg2: i32) -> (i32, i32, i32, i32) {
    %c0_i32 = arith.constant 0 : i32
    %c0_i32_0 = arith.constant 0 : i32
    return %arg0, %arg1, %arg2, %c0_i32 : i32, i32, i32, i32
  }
}

</mosaic_0001>

<bundles_post_ra>
// kernel: tpu_custom_call.1
= control target key start
LH: loop header
LB: loop body
LE: loop exit
PB: predicated region body
PF: predicated region fallthrough
CT: control target
= control target key end

     0   :  { %6 = vsyncpa [#allocation3], 0  ;;  %s775_s0 = inlined_call_operand.hbm [shape: f32[2,8,2,8,8], index: 0, kind: input, shape index: {}]   ;;  %s776_s1 = inlined_call_operand.hbm [shape: f32[2,8,8,16], index: 1, kind: output, shape index: {}]  }
   0x1   :  { %8 = vsyncpa [#allocation3 + $0x1], 0 }
   0x2   :  { %9 = vsyncpa [#allocation4], 0 }
   0x3   :  { %11 = vsyncpa [#allocation4 + $0x1], 0  ;;  %s556_s6 = smov 0   ;;  %s558_s7 = smov 0  }
   0x4   :  { %s560_s8 = smov 0   ;;  %s562_s9 = smov 0  }
   0x5   :  { %s564_s10 = smov 0   ;;  %s566_s11 = smov 0  }
   0x6 LB: > { %s343_s12 = sadd.s32 4294967295, %s538_s11   ;;  %s344_s13 = sadd.s32 4294967294, %s538_s11   ;;  %s538_s11 = sphi %s566_s11, %s17_s11   ;;  %s534_s10 = sphi %s564_s10, %s791_s10   ;;  %s530_s9 = sphi %s562_s9, %s790_s9   ;;  %s526_s8 = sphi %s560_s8, %s789_s8   ;;  %s522_s7 = sphi %s558_s7, %s788_s7   ;;  %s518_s6 = sphi %s556_s6, %s787_s6  }
   0x7   : > { %s36_s14 = sadd.s32 1, %s534_s10  ;;  %s47_s15 = sadd.s32 1, %s526_s8 }
   0x8   : > { %p38_p0 = scmp.ge.s32.totalorder %s36_s14, 2  ;;  %p54_p1 = scmp.ne.s32.totalorder %s526_s8, %s522_s7 }
   0x9   : > { %p55_p2 = scmp.eq.s32.totalorder %s538_s11, 0  ;;  %p60_p3 = scmp.ne.s32.totalorder %s522_s7, %s518_s6 }
   0xa   : > { %s793_s14 = smov (%p38_p0, %s36_s14), 0  ;;  %p61_p5 = scmp.eq.s32.totalorder %s343_s12, 0 }
   0xb   : > { %p597_p4 = por %p55_p2, %p54_p1  ;;  %s40_s17 = ssub.s32 %s534_s10, %s793_s14 }
   0xc   : > { %p88_p6 = scmp.eq.s32.totalorder %s343_s12, 1  ;;  %p45_p7 = scmp.eq.s32.totalorder %s40_s17, 0 }
   0xd   : > { %p603_p8 = por %p61_p5, %p60_p3  ;;  %p94_p10 = scmp.eq.s32.totalorder %s344_s13, 1 }
   0xe   : > { %p607_p9 = por %p88_p6, %p54_p1  ;;  %p372_p13 = scmp.lt.s32.totalorder %s538_s11, 2 }
   0xf   : > { %s612_s20 = scalar_select %p45_p7, %s526_s8, %s47_s15  }
  0x10   : > { %s780_s19 = scalar_select %p607_p9, 1, 0 }
  0x11   : > { %p614_p11 = por %p94_p10, %p60_p3  ;;  %s114_s22 = sand.u32 1, %s526_s8  }
  0x12   : > { %s347_s23 = sshll.u32 %s114_s22, 7  ;;  %s358_s24 = sshll.u32 %s534_s10, 11 }
  0x13   : > { %s781_s21 = scalar_select %p614_p11, 1, 0 }
  0x14   : > { %s625_s27 = scalar_lea.hbm %s775_s0, %s358_s24  ;;  %s118_s28 = scalar_lea.vmem [#allocation2], %s347_s23 }
  0x15   : > { %s129_s29 = sshll.u32 %s118_s28, 4  ;;  %p631_p0 = pnand %p372_p13, %p597_p4  ;;  %s627_s29 = int_to_ptr.vmem [resolvable:$true] %s129_s29 }
  0x16   : > { %s636_s2 = scalar_lea.sflag [#allocation3], %s114_s22  ;;  %s426_s3 = scalar_lea.hbm %s625_s27, 2048 }
  0x17   : > { %p427_p2 = scmp.ne.s32.totalorder %s625_s27, %s426_s3  ;;  %p428_p3 = pneg %p631_p0 }
  0x18   : > { %s431_s12 = scalar_lea.hbm %s775_s0, 4096  ;;  %p432_p4 = scmp.lt.u32.totalorder %s625_s27, %s775_s0 }
  0x19   : > { %p429_p5 = pnand %p428_p3, %p427_p2  ;;  %p433_p7 = scmp.lt.u32.totalorder %s431_s12, %s426_s3 }
  0x1a   : > { %p435_p13 = scmp.lt.u32.totalorder %s426_s3, %s625_s27 }
  0x1b   : > { %p430_p6 = pneg %p429_p5  ;;  %p434_p10 = por %p433_p7, %p432_p4 }
  0x1d   : > { %p436_p12 = por %p435_p13, %p434_p10 }
  0x1f   : > { %p437_p1 = pnand %p436_p12, %p430_p6 }
  0x21   : > { %440 = shalt.err (!%p437_p1)
}
  0x22   : > { %s441_s16 = scalar_lea.vmem %s627_s29, 2048  ;;  %s540_s17 = smov [#allocation2]  }
  0x23   : > { %p442_p2 = scmp.ne.s32.totalorder %s627_s29, %s441_s16  ;;  %s446_s22 = sshll.u32 %s540_s17, 4  ;;  %s447_s22 = int_to_ptr.vmem [resolvable:$false] %s446_s22 }
  0x24   : > { %s448_s23 = scalar_lea.vmem %s447_s22, 4096  ;;  %p449_p9 = scmp.lt.s32.totalorder %s627_s29, %s447_s22 }
  0x25   : > { %p444_p5 = pnand %p442_p2, %p428_p3  ;;  %p450_p4 = scmp.lt.s32.totalorder %s448_s23, %s441_s16 }
  0x27   : > { %p445_p11 = pneg %p444_p5  ;;  %p451_p7 = por %p450_p4, %p449_p9 }
  0x29   : > { %p452_p10 = pnand %p451_p7, %p445_p11 }
  0x2b   : > { %455 = shalt.err (!%p452_p10)
}
  0x2c   : > { %s541_s24 = smov 128   ;;  %s542_s25 = smov 8  }
  0x2d   : > { %367 = dma.hbm_to_vmem [thread:$0]  (!%p631_p0), %s625_s27, 2048, %s627_s29, %s636_s2, %s541_s24, %s541_s24, %s542_s25  }
  0x2e   : > { %p137_p12 = scmp.lt.s32.totalorder %s538_s11, 3  ;;  %p783_p1 = scmp.ge.s32.totalorder %s538_s11, 1 }
  0x30   : > { %p138_p3 = pnand %p783_p1, %p137_p12 }
  0x31   : > { %s668_s26 = sand.u32 (!%p138_p3), 1, %s522_s7  }
  0x32   : > { %141 = sbr.rel (%p138_p3) target bundleno = 203 (0xcb), region = 24  ;;  %s351_s28 = sshll.u32 (!%p138_p3), %s668_s26, 7 }
  0x33   : > { %s144_s3 = scalar_lea.sflag (!%p138_p3), [#allocation3], %s668_s26  ;;  %s672_s4 = scalar_lea.vmem (!%p138_p3), [#allocation2], %s351_s28 }
  0x39   : > { %509 = dma.done.wait (%p603_p8), %s144_s3, 2048  }
  0x3a   : > { %511 = vsyncadd (%p603_p8), %s144_s3, 4294965248  ;;  %v173_v0 = vld [vmem:[%s672_s4 + $0x28] sm:$0xff]  ;;  %s543_s27 = smov 8   ;;  %v175_v2 = vld [vmem:[%s672_s4 + $0x38] sm:$0xff]  ;;  %s352_s18 = sshll.u32 %s668_s26, 6  ;;  %vm216_vm0 = vcmask 64512  }
  0x3b   : > { %v169_v1 = vld [vmem:[%s672_s4 + $0x8] sm:$0xff]  ;;  %196 = vrot.lane.b32.xlu1 %v173_v0, %s543_s27  ;;  %v171_v3 = vld [vmem:[%s672_s4 + $0x18] sm:$0xff]  ;;  %v172_v8 = vld [vmem:[%s672_s4 + $0x20] sm:$0xff]  ;;  %vm225_vm1 = vcmask 130048   ;;  %s165_s29 = scalar_lea.vmem [#allocation5], %s352_s18  ;;  %s359_s2 = sshll.u32 %s530_s9, 10 }
  0x3c   : > { %192 = vrot.lane.b32.xlu0 %v169_v1, %s543_s27  ;;  %v179_v4 = vld [vmem:[%s672_s4 + $0x58] sm:$0xff]  ;;  %v177_v5 = vld [vmem:[%s672_s4 + $0x48] sm:$0xff]  ;;  %v168_v9 = vld [vmem:[%s672_s4] sm:$0xff]  ;;  %s251_s30 = sshll.u32 %s165_s29, 4  ;;  %s721_s13 = scalar_lea.hbm %s776_s1, %s359_s2  ;;  %s716_s30 = int_to_ptr.vmem [resolvable:$true] %s251_s30 }
  0x3d   : > { %v183_v6 = vld [vmem:[%s672_s4 + $0x78] sm:$0xff]  ;;  %v181_v7 = vld [vmem:[%s672_s4 + $0x68] sm:$0xff]  ;;  %v174_v14 = vld [vmem:[%s672_s4 + $0x30] sm:$0xff]  ;;  %s235_s9 = scalar_lea.sflag [#allocation4], %s668_s26  ;;  %s456_s15 = scalar_lea.vmem %s716_s30, 1024 }
  0x3e   : > { %v170_v15 = vld [vmem:[%s672_s4 + $0x10] sm:$0xff]  ;;  %v176_v21 = vld [vmem:[%s672_s4 + $0x40] sm:$0xff]  ;;  %p457_p8 = scmp.ne.s32.totalorder %s716_s30, %s456_s15  ;;  %p784_p9 = scmp.ne.s32.totalorder %s780_s19, 0 }
  0x3f   : > { %198 = vrot.lane.b32.xlu1 %v175_v2, %s543_s27  ;;  %v178_v20 = vld [vmem:[%s672_s4 + $0x50] sm:$0xff]  ;;  %v180_v27 = vld [vmem:[%s672_s4 + $0x60] sm:$0xff]  ;;  %s544_s16 = smov [#allocation5]  }
  0x40   : > { %194 = vrot.lane.b32.xlu0 %v171_v3, %s543_s27  ;;  %v182_v26 = vld [vmem:[%s672_s4 + $0x70] sm:$0xff]  ;;  %p458_p11 = pnand %p457_p8, %p784_p9  ;;  %s460_s17 = sshll.u32 %s544_s16, 4  ;;  %s461_s17 = int_to_ptr.vmem [resolvable:$false] %s460_s17 }
  0x41   : > { %s462_s22 = scalar_lea.vmem %s461_s17, 2048  ;;  %p463_p6 = scmp.lt.s32.totalorder %s716_s30, %s461_s17 }
  0x42   : > { %p459_p0 = pneg %p458_p11  ;;  %p464_p13 = scmp.lt.s32.totalorder %s462_s22, %s456_s15 }
  0x43   : > { %202 = vrot.lane.b32.xlu1 %v179_v4, %s543_s27 }
  0x44   : > { %200 = vrot.lane.b32.xlu0 %v177_v5, %s543_s27  ;;  %p465_p2 = por %p464_p13, %p463_p6 }
  0x46   : > { %p466_p5 = pnand %p465_p2, %p459_p0 }
  0x47   : > { %206 = vrot.lane.b32.xlu1 %v183_v6, %s543_s27 }
  0x48   : > { %204 = vrot.lane.b32.xlu0 %v181_v7, %s543_s27 }
  0xad   : > { %v197_v10 = vpop.permute.xlu1 %196 }
  0xae   : > { %v193_v11 = vpop.permute.xlu0 %192  ;;  %v219_v12 = vsel %vm216_vm0, %v172_v8, %v197_v10 }
  0xaf   : > { %v217_v13 = vsel %vm216_vm0, %v168_v9, %v193_v11  ;;  %228 = vst.msk [vmem:[%s165_s29 + $0x10] sm:$0xff] %vm225_vm1, %v219_v12 }
  0xb0   : > { %226 = vst.msk [vmem:[%s165_s29] sm:$0xff] %vm225_vm1, %v217_v13 }
  0xb1   : > { %v199_v16 = vpop.permute.xlu1 %198 }
  0xb2   : > { %v195_v17 = vpop.permute.xlu0 %194  ;;  %v220_v18 = vsel %vm216_vm0, %v174_v14, %v199_v16 }
  0xb3   : > { %v218_v19 = vsel %vm216_vm0, %v170_v15, %v195_v17  ;;  %229 = vst.msk [vmem:[%s165_s29 + $0x18] sm:$0xff] %vm225_vm1, %v220_v18 }
  0xb4   : > { %227 = vst.msk [vmem:[%s165_s29 + $0x8] sm:$0xff] %vm225_vm1, %v218_v19 }
  0xb5   : > { %v203_v22 = vpop.permute.xlu1 %202 }
  0xb6   : > { %v201_v23 = vpop.permute.xlu0 %200  ;;  %v222_v24 = vsel %vm216_vm0, %v178_v20, %v203_v22 }
  0xb7   : > { %v221_v25 = vsel %vm216_vm0, %v176_v21, %v201_v23  ;;  %231 = vst.msk [vmem:[%s165_s29 + $0x28] sm:$0xff] %vm225_vm1, %v222_v24 }
  0xb8   : > { %230 = vst.msk [vmem:[%s165_s29 + $0x20] sm:$0xff] %vm225_vm1, %v221_v25 }
  0xb9   : > { %v207_v28 = vpop.permute.xlu1 %206 }
  0xba   : > { %v205_v29 = vpop.permute.xlu0 %204  ;;  %v224_v30 = vsel %vm216_vm0, %v182_v26, %v207_v28 }
  0xbb   : > { %v223_v31 = vsel %vm216_vm0, %v180_v27, %v205_v29  ;;  %233 = vst.msk [vmem:[%s165_s29 + $0x38] sm:$0xff] %vm225_vm1, %v224_v30 }
  0xbc   : > { %232 = vst.msk [vmem:[%s165_s29 + $0x30] sm:$0xff] %vm225_vm1, %v223_v31 }
  0xbd   : > { %469 = shalt.err (!%p466_p5)
}
  0xbe   : > { %s470_s23 = scalar_lea.hbm %s721_s13, 1024  ;;  %s474_s28 = scalar_lea.hbm %s776_s1, 2048 }
  0xbf   : > { %p471_p4 = scmp.ne.s32.totalorder %s721_s13, %s470_s23  ;;  %p475_p12 = scmp.lt.u32.totalorder %s721_s13, %s776_s1 }
  0xc0   : > { %p476_p1 = scmp.lt.u32.totalorder %s474_s28, %s470_s23  ;;  %p478_p8 = scmp.lt.u32.totalorder %s470_s23, %s721_s13 }
  0xc1   : > { %p472_p7 = pnand %p471_p4, %p784_p9 }
  0xc2   : > { %p477_p3 = por %p476_p1, %p475_p12 }
  0xc3   : > { %p473_p10 = pneg %p472_p7 }
  0xc4   : > { %p479_p11 = por %p478_p8, %p477_p3 }
  0xc6   : > { %p480_p0 = pnand %p479_p11, %p473_p10 }
  0xc8   : > { %483 = shalt.err (!%p480_p0)
}
  0xc9   : > { %s545_s18 = smov 128  }
  0xca   : > { %362 = dma.vmem_to_hbm [thread:$0]  (%p784_p9), %s716_s30, 1024, %s721_s13, %s235_s9, %s545_s18, %s545_s18, %s543_s27  }
  0xcb PF: > { %s266_s29 = sand.u32 1, %s518_s6   ;;  %p785_p6 = scmp.ne.s32.totalorder %s781_s21, 0 }
  0xcc   : > { %p786_p13 = scmp.ge.s32.totalorder %s538_s11, 2  ;;  %s267_s2 = scalar_lea.sflag [#allocation4], %s266_s29 }
  0xce   : > { %p369_p2 = pnand %p786_p13, %p785_p6 }
  0xd0   : > { %513 = dma.done.wait (!%p369_p2), %s267_s2, 1024  }
  0xd1   : > { %515 = vsyncadd (!%p369_p2), %s267_s2, 4294966272  ;;  %s17_s11 = sadd.s32 1, %s538_s11   ;;  %s787_s6 = smov %s522_s7 }
  0xd2   : > { %p14_p5 = scmp.ge.s32.totalorder %s17_s11, 4   ;;  %s788_s7 = smov %s526_s8 }
  0xd3   : > { %s789_s8 = smov %s612_s20  ;;  %s790_s9 = smov %s534_s10 }
  0xd4   : > { %s791_s10 = smov %s793_s14  ;;  %16 = sbr.rel (!%p14_p5) target bundleno = 6 (0x6), region = 69 }
  0xdb   :  { %272 = vsyncpa [#allocation3], 1 }
  0xdc   :  { %274 = vsyncpa [#allocation3 + $0x1], 1 }
  0xdd   :  { %275 = vsyncpa [#allocation4], 1 }
  0xde   :  { %277 = vsyncpa [#allocation4 + $0x1], 1 }

</bundles_post_ra>
